<compile_context>
chip_gen: v7x
topology: tpu7x:2x2x1
jax: 0.10.0
libtpu: 0.0.40
codegen_flags: <defaults>
</compile_context>

<pallas_src>
import math

import jax
import jax.numpy as jnp
from jax.experimental import pallas as pl
from jax.experimental.pallas import tpu as pltpu


# ---------------------------------------------------------------------------
# Kernels
# ---------------------------------------------------------------------------

def _cls_embed_rows_kernel(w_ref, x_ref, o_ref):
    # w_ref: (1, D)          -- CLS weight row (already x.dtype)
    # x_ref: (Bt, S*D)       -- Bt batch rows, tokens flattened on the lane axis
    # o_ref: (Bt, (S+1)*D)   -- same batch rows of the output
    bt = o_ref.shape[0]
    d = w_ref.shape[1]
    # CLS slot: columns [0, D).  One broadcast per block, no casts.
    o_ref[:, :d] = jnp.broadcast_to(w_ref[...], (bt, d))
    # Token payload: columns [D, (S+1)*D).  Lane-aligned when D % 128 == 0.
    o_ref[:, d:] = x_ref[...]


def _cls_embed_tokens_kernel(w_ref, x_ref, o_ref):
    # Fallback for very long rows (large S*D): grid = (batch blocks, S+1),
    # one output token per step.  Step 0 writes the CLS slab, steps >= 1 copy
    # input token (tok - 1).
    # w_ref: (1, 1, D); x_ref: (Bt, 1, D); o_ref: (Bt, 1, D)
    tok = pl.program_id(1)

    @pl.when(tok == 0)
    def _():
        o_ref[...] = jnp.broadcast_to(w_ref[...], o_ref.shape)

    @pl.when(tok > 0)
    def _():
        o_ref[...] = x_ref[...]


# ---------------------------------------------------------------------------
# Block-size / VMEM budgeting
# ---------------------------------------------------------------------------

def _budgets():
    """Return (per-step in+out payload target bytes, scoped-VMEM ceiling bytes)."""
    step_target = 8 << 20
    vmem_cap = 48 << 20            # safe on every generation
    try:
        info = pltpu.get_tpu_info()
        phys = int(getattr(info, "vmem_capacity_bytes", 128 << 20))
        if phys <= (64 << 20):     # v7x-class: 3.2 TB/s HBM, 64 MiB VMEM / TC
            step_target = 12 << 20
            vmem_cap = 48 << 20    # leave headroom below physical VMEM
        else:                      # v5e / v6e: 128 MiB VMEM
            step_target = 8 << 20
            vmem_cap = 64 << 20
    except Exception:
        pass
    return step_target, vmem_cap


def _round8_prefer_divisor(bb, B):
    """Round bb down to a multiple of 8 (>= 8); prefer a divisor of B."""
    bb = max(8, (int(bb) // 8) * 8)
    if B % bb:
        cand = bb
        while cand > 8 and B % cand:
            cand -= 8
        if cand >= 8 and B % cand == 0:
            bb = cand
    return min(bb, B)


def _pick_block_b_rows(B, S, D, itemsize, step_target):
    row_bytes = (2 * S + 1) * D * itemsize        # one input row + one output row
    total_bytes = B * row_bytes
    if B <= 8 or total_bytes <= (1 << 20):
        return B                                  # tiny: one step, overhead dominates anyway
    bb = min(step_target // max(row_bytes, 1), B // 4)   # keep >= ~4 grid steps
    return _round8_prefer_divisor(bb, B)


def _pick_block_b_tokens(B, D, itemsize, step_target, vmem_cap):
    tok_bytes = 2 * D * itemsize                  # in + out, one token per row
    bb = max(1, step_target // max(tok_bytes, 1))
    bb = max(8, (int(bb) // 8) * 8)
    while 2 * bb * tok_bytes + (2 << 20) > vmem_cap and bb > 8:
        bb = max(8, (bb // 2 // 8) * 8)
    if bb >= B:
        return B
    return _round8_prefer_divisor(bb, B)


# ---------------------------------------------------------------------------
# pallas_call wrappers
# ---------------------------------------------------------------------------

def _cls_embedding_rows(x_flat, w2d, B, S, D, block_b, vmem_cap):
    in_cols = S * D
    out_cols = (S + 1) * D
    itemsize = x_flat.dtype.itemsize
    blk_bytes = block_b * (in_cols + out_cols) * itemsize
    vmem_limit = int(min(vmem_cap, max(2 * blk_bytes + (2 << 20), 8 << 20)))
    grid = (pl.cdiv(B, block_b),)

    out_flat = pl.pallas_call(
        _cls_embed_rows_kernel,
        out_shape=jax.ShapeDtypeStruct((B, out_cols), x_flat.dtype),
        grid_spec=pltpu.PrefetchScalarGridSpec(
            num_scalar_prefetch=0,
            grid=grid,
            in_specs=[
                pl.BlockSpec((1, D), lambda b: (0, 0)),              # weight (resident)
                pl.BlockSpec((block_b, in_cols), lambda b: (b, 0)),  # x rows, flattened
            ],
            out_specs=pl.BlockSpec((block_b, out_cols), lambda b: (b, 0)),
        ),
        compiler_params=pltpu.CompilerParams(
            dimension_semantics=("parallel",),
            vmem_limit_bytes=vmem_limit,
        ),
    )(w2d, x_flat)
    return out_flat.reshape(B, S + 1, D)


def _cls_embedding_tokens(x, w, B, S, D, block_b, vmem_cap):
    itemsize = x.dtype.itemsize
    blk_bytes = 2 * block_b * D * itemsize
    vmem_limit = int(min(vmem_cap, max(2 * blk_bytes + (2 << 20), 8 << 20)))
    w3d = w.reshape(1, 1, D)
    grid = (pl.cdiv(B, block_b), S + 1)

    return pl.pallas_call(
        _cls_embed_tokens_kernel,
        out_shape=jax.ShapeDtypeStruct((B, S + 1, D), x.dtype),
        grid_spec=pltpu.PrefetchScalarGridSpec(
            num_scalar_prefetch=0,
            grid=grid,
            in_specs=[
                pl.BlockSpec((1, 1, D), lambda b, t: (0, 0, 0)),
                pl.BlockSpec((block_b, 1, D),
                             lambda b, t: (b, jnp.maximum(t - 1, 0), 0)),
            ],
            out_specs=pl.BlockSpec((block_b, 1, D), lambda b, t: (b, t, 0)),
        ),
        compiler_params=pltpu.CompilerParams(
            dimension_semantics=("parallel", "arbitrary"),
            vmem_limit_bytes=vmem_limit,
        ),
    )(w3d, x)


def cls_embedding(x: jax.Array, weight: jax.Array) -> jax.Array:
    """x: (B, S, D), weight: (D,) -> (B, S+1, D) == concat([cls, x], axis=1)."""
    assert x.ndim == 3
    B, S, D = x.shape
    assert weight.shape == (D,)
    w = weight.astype(x.dtype)                    # cast once, outside the kernel

    step_target, vmem_cap = _budgets()
    itemsize = x.dtype.itemsize
    in_cols, out_cols = S * D, (S + 1) * D

    block_b = _pick_block_b_rows(B, S, D, itemsize, step_target)
    blk_bytes = block_b * (in_cols + out_cols) * itemsize
    if 2 * blk_bytes + (2 << 20) > vmem_cap:
        # Rows are too long for the row-chunked path: try the smallest legal
        # batch block, otherwise tile over tokens (shape-robust fallback).
        small_b = B if B <= 8 else 8
        small_bytes = small_b * (in_cols + out_cols) * itemsize
        if 2 * small_bytes + (2 << 20) <= vmem_cap:
            block_b = small_b
        else:
            tok_b = _pick_block_b_tokens(B, D, itemsize, step_target, vmem_cap)
            return _cls_embedding_tokens(x, w, B, S, D, tok_b, vmem_cap)

    x_flat = x.reshape(B, in_cols)                # free, contiguous reshape
    w2d = w.reshape(1, D)
    return _cls_embedding_rows(x_flat, w2d, B, S, D, block_b, vmem_cap)


# ---------------------------------------------------------------------------
# Self-test
# ---------------------------------------------------------------------------

def _reference(x, weight):
    B, _, D = x.shape
    cls = jnp.broadcast_to(weight.astype(x.dtype)[None, None, :], (B, 1, D))
    return jnp.concatenate([cls, x], axis=1)


def _make_case(key, B, S, D, dtype=jnp.float32):
    kx, kw = jax.random.split(key)
    d_sqrt_inv = 1.0 / math.sqrt(D)
    weight = jax.random.uniform(kw, (D,), jnp.float32, -d_sqrt_inv, d_sqrt_inv)
    x = jax.random.normal(kx, (B, S, D), dtype)
    return x, weight


if __name__ == "__main__":
    key = jax.random.PRNGKey(0)
    k1, k2, k3 = jax.random.split(key, 3)

    # Case 1: lane-aligned (D % 128 == 0), tiny -> single-step row path.
    x1, w1 = _make_case(k1, 16, 8, 128)
    o1 = jax.block_until_ready(cls_embedding(x1, w1))
    assert o1.shape == (16, 9, 128)
    assert jnp.allclose(o1, _reference(x1, w1)), "mismatch (aligned case)"

    # Case 2: small D (< 128), B not a multiple of 8 -> full-batch block,
    # lane-offset store path.
    x2, w2 = _make_case(k2, 2, 8, 32)
    o2 = jax.block_until_ready(cls_embedding(x2, w2))
    assert o2.shape == (2, 9, 32)
    assert jnp.allclose(o2, _reference(x2, w2)), "mismatch (small-D case)"

    # Case 3: large enough to exercise the multi-step pipelined grid
    # (>= 4 steps, block_b a divisor of B).
    x3, w3 = _make_case(k3, 64, 24, 128)
    o3 = jax.block_until_ready(cls_embedding(x3, w3))
    assert o3.shape == (64, 25, 128)
    assert jnp.allclose(o3, _reference(x3, w3)), "mismatch (multi-step case)"

    print("KERNEL_OK")
</pallas_src>

<mosaic_0001>
module attributes {stable_mosaic.version = 11 : i64} {
  func.func @_cls_embed_rows_kernel(%arg0: i32, %arg1: memref<1x128xf32, #tpu.memory_space<vmem>>, %arg2: memref<16x1024xf32, #tpu.memory_space<vmem>>, %arg3: memref<16x1152xf32, #tpu.memory_space<vmem>>) attributes {dimension_semantics = [#tpu.dimension_semantics<parallel>], iteration_bounds = array<i64: 1>, scalar_prefetch = 0 : i64, scratch_operands = 0 : i64, tpu.core_type = #tpu.core_type<tc>, window_params = [{pipeline_mode = #tpu.pipeline_mode<synchronous>, transform_indices = @transform_0, window_bounds = array<i64: 1, 128>}, {transform_indices = @transform_1, window_bounds = array<i64: 16, 1024>}, {transform_indices = @transform_2, window_bounds = array<i64: 16, 1152>}]} {
    %c0 = arith.constant 0 : index
    %c0_0 = arith.constant 0 : index
    %0 = vector.load %arg1[%c0, %c0_0] : memref<1x128xf32, #tpu.memory_space<vmem>>, vector<1x128xf32>
    %1 = vector.shape_cast %0 : vector<1x128xf32> to vector<1x128xf32>
    %2 = vector.broadcast %1 : vector<1x128xf32> to vector<16x128xf32>
    %c0_1 = arith.constant 0 : index
    %c0_2 = arith.constant 0 : index
    %3 = vector.load %arg3[%c0_1, %c0_2] : memref<16x1152xf32, #tpu.memory_space<vmem>>, vector<16x128xf32>
    tpu.vector_store %arg3[%c0_1, %c0_2], %2 {strides = array<i32>} : memref<16x1152xf32, #tpu.memory_space<vmem>>, vector<16x128xf32>,
    %c0_3 = arith.constant 0 : index
    %c0_4 = arith.constant 0 : index
    %4 = vector.load %arg2[%c0_3, %c0_4] : memref<16x1024xf32, #tpu.memory_space<vmem>>, vector<16x1024xf32>
    %c0_5 = arith.constant 0 : index
    %c128 = arith.constant 128 : index
    %5 = vector.load %arg3[%c0_5, %c128] : memref<16x1152xf32, #tpu.memory_space<vmem>>, vector<16x1024xf32>
    tpu.vector_store %arg3[%c0_5, %c128], %4 {strides = array<i32>} : memref<16x1152xf32, #tpu.memory_space<vmem>>, vector<16x1024xf32>,
    return
  }
  func.func @transform_0(%arg0: i32) -> (i32, i32) {
    %c0_i32 = arith.constant 0 : i32
    %c0_i32_0 = arith.constant 0 : i32
    %c0_i32_1 = arith.constant 0 : i32
    return %c0_i32, %c0_i32_0 : i32, i32
  }
  func.func @transform_1(%arg0: i32) -> (i32, i32) {
    %c0_i32 = arith.constant 0 : i32
    %c0_i32_0 = arith.constant 0 : i32
    return %arg0, %c0_i32 : i32, i32
  }
  func.func @transform_2(%arg0: i32) -> (i32, i32) {
    %c0_i32 = arith.constant 0 : i32
    %c0_i32_0 = arith.constant 0 : i32
    return %arg0, %c0_i32 : i32, i32
  }
}

</mosaic_0001>

<bundles_post_ra>
// kernel: tpu_custom_call.1
= control target key start
LH: loop header
LB: loop body
LE: loop exit
PB: predicated region body
PF: predicated region fallthrough
CT: control target
= control target key end

     0   :  { %7 = vsyncpa [#allocation3], 0  ;;  %s242_s0 = inlined_call_operand.hbm [shape: f32[1,128], index: 0, kind: input, shape index: {}]   ;;  %s243_s1 = inlined_call_operand.hbm [shape: f32[16,1024], index: 1, kind: input, shape index: {}]   ;;  %s244_s2 = inlined_call_operand.hbm [shape: f32[16,1152], index: 2, kind: output, shape index: {}]  }
   0x1   :  { %8 = vsyncpa [#allocation6], 0 }
   0x2   :  { %9 = vsyncpa [#allocation4], 0  ;;  %s177_s9 = smov [#allocation2]   ;;  %s178_s11 = smov [#allocation5]  }
   0x3   :  { %s16_s10 = sshll.u32 %s177_s9, 4  ;;  %s25_s12 = sshll.u32 %s178_s11, 4  ;;  %s17_s10 = int_to_ptr.vmem [resolvable:$true] %s16_s10  ;;  %s199_s12 = int_to_ptr.vmem [resolvable:$true] %s25_s12 }
   0x4   :  { %s105_s15 = scalar_lea.hbm %s242_s0, 16 }
   0x5   :  { %p106_p0 = scmp.ne.s32.totalorder %s242_s0, %s105_s15  ;;  %p109_p1 = scmp.lt.u32.totalorder %s105_s15, %s242_s0 }
   0x7   :  { %p111_p2 = pnand %p109_p1, %p106_p0 }
   0x9   :  { %114 = shalt.err (!%p111_p2)
}
   0xa   :  { %s115_s20 = scalar_lea.vmem %s17_s10, 16  ;;  %s119_s21 = scalar_lea.vmem %s17_s10, 32 }
   0xb   :  { %p116_p3 = scmp.ne.s32.totalorder %s17_s10, %s115_s20  ;;  %p120_p4 = scmp.lt.s32.totalorder %s17_s10, %s17_s10 }
   0xc   :  { %p121_p5 = scmp.lt.s32.totalorder %s119_s21, %s115_s20 }
   0xe   :  { %p122_p6 = por %p121_p5, %p120_p4 }
  0x10   :  { %p123_p7 = pnand %p122_p6, %p116_p3 }
  0x12   :  { %126 = shalt.err (!%p123_p7)
}
  0x13   :  { %19 = dma.hbm_to_vmem [thread:$0]  %s242_s0, 16, %s17_s10, [#allocation3]  }
  0x14   :  { %s127_s26 = scalar_lea.hbm %s243_s1, 2048 }
  0x15   :  { %p128_p8 = scmp.ne.s32.totalorder %s243_s1, %s127_s26  ;;  %p131_p9 = scmp.lt.u32.totalorder %s127_s26, %s243_s1 }
  0x17   :  { %p133_p10 = pnand %p131_p9, %p128_p8 }
  0x19   :  { %136 = shalt.err (!%p133_p10)
}
  0x1a   :  { %s137_s3 = scalar_lea.vmem %s199_s12, 2048  ;;  %p142_p12 = scmp.lt.s32.totalorder %s199_s12, %s199_s12 }
  0x1b   :  { %p138_p11 = scmp.ne.s32.totalorder %s199_s12, %s137_s3  ;;  %p143_p13 = scmp.lt.s32.totalorder %s137_s3, %s137_s3 }
  0x1d   :  { %p144_p0 = por %p143_p13, %p142_p12 }
  0x1f   :  { %p145_p1 = pnand %p144_p0, %p138_p11 }
  0x21   :  { %148 = shalt.err (!%p145_p1)
}
  0x22   :  { %s179_s0 = smov 1024   ;;  %s180_s4 = smov 64  }
  0x23   :  { %31 = dma.hbm_to_vmem [thread:$0]  %s243_s1, 2048, %s199_s12, [#allocation6], %s179_s0, %s179_s0, %s180_s4  }
  0x24   :  { %171 = dma.done.wait [#allocation3], 16  }
  0x25   :  { %172 = vsyncadd [#allocation3], 4294967280 }
  0x26   :  { %173 = dma.done.wait [#allocation6], 2048  }
  0x27   :  { %174 = vsyncadd [#allocation6], 4294965248  ;;  %v97_v0 = vld [vmem:[#allocation2] ss:$0 sm:$0xff]  ;;  %v47_v1 = vld [vmem:[#allocation5] sm:$0xff]  ;;  %s181_s7 = smov [#allocation7]  }
  0x28   :  { %v48_v2 = vld [vmem:[#allocation5 + $0x8] sm:$0xff]  ;;  %45 = vst [vmem:[#allocation7] sm:$0xff] %v97_v0  ;;  %46 = vst [vmem:[#allocation7 + $0x48] sm:$0xff] %v97_v0  ;;  %v49_v3 = vld [vmem:[#allocation5 + $0x10] sm:$0xff]  ;;  %s84_s8 = sshll.u32 %s181_s7, 4  ;;  %s85_s8 = int_to_ptr.vmem [resolvable:$true] %s84_s8 }
  0x29   :  { %63 = vst [vmem:[#allocation7 + $0x8] sm:$0xff] %v47_v1  ;;  %64 = vst [vmem:[#allocation7 + $0x10] sm:$0xff] %v48_v2  ;;  %v50_v4 = vld [vmem:[#allocation5 + $0x18] sm:$0xff]  ;;  %v51_v5 = vld [vmem:[#allocation5 + $0x20] sm:$0xff]  ;;  %s149_s1 = scalar_lea.vmem %s85_s8, 2304  ;;  %p154_p3 = scmp.lt.s32.totalorder %s85_s8, %s85_s8 }
  0x2a   :  { %65 = vst [vmem:[#allocation7 + $0x18] sm:$0xff] %v49_v3  ;;  %66 = vst [vmem:[#allocation7 + $0x20] sm:$0xff] %v50_v4  ;;  %v52_v6 = vld [vmem:[#allocation5 + $0x28] sm:$0xff]  ;;  %v53_v7 = vld [vmem:[#allocation5 + $0x30] sm:$0xff]  ;;  %p150_p2 = scmp.ne.s32.totalorder %s85_s8, %s149_s1  ;;  %p155_p4 = scmp.lt.s32.totalorder %s149_s1, %s149_s1 }
  0x2b   :  { %67 = vst [vmem:[#allocation7 + $0x28] sm:$0xff] %v51_v5  ;;  %v54_v8 = vld [vmem:[#allocation5 + $0x38] sm:$0xff]  ;;  %68 = vst [vmem:[#allocation7 + $0x30] sm:$0xff] %v52_v6  ;;  %v55_v9 = vld [vmem:[#allocation5 + $0x40] sm:$0xff] }
  0x2c   :  { %69 = vst [vmem:[#allocation7 + $0x38] sm:$0xff] %v53_v7  ;;  %70 = vst [vmem:[#allocation7 + $0x40] sm:$0xff] %v54_v8  ;;  %v56_v10 = vld [vmem:[#allocation5 + $0x48] sm:$0xff]  ;;  %v57_v11 = vld [vmem:[#allocation5 + $0x50] sm:$0xff]  ;;  %p156_p5 = por %p155_p4, %p154_p3 }
  0x2d   :  { %71 = vst [vmem:[#allocation7 + $0x50] sm:$0xff] %v55_v9  ;;  %72 = vst [vmem:[#allocation7 + $0x58] sm:$0xff] %v56_v10  ;;  %v58_v12 = vld [vmem:[#allocation5 + $0x58] sm:$0xff]  ;;  %v59_v13 = vld [vmem:[#allocation5 + $0x60] sm:$0xff] }
  0x2e   :  { %73 = vst [vmem:[#allocation7 + $0x60] sm:$0xff] %v57_v11  ;;  %v60_v14 = vld [vmem:[#allocation5 + $0x68] sm:$0xff]  ;;  %74 = vst [vmem:[#allocation7 + $0x68] sm:$0xff] %v58_v12  ;;  %v61_v15 = vld [vmem:[#allocation5 + $0x70] sm:$0xff]  ;;  %p157_p6 = pnand %p156_p5, %p150_p2 }
  0x2f   :  { %75 = vst [vmem:[#allocation7 + $0x70] sm:$0xff] %v59_v13  ;;  %76 = vst [vmem:[#allocation7 + $0x78] sm:$0xff] %v60_v14  ;;  %v62_v16 = vld [vmem:[#allocation5 + $0x78] sm:$0xff] }
  0x30   :  { %77 = vst [vmem:[#allocation7 + $0x80] sm:$0xff] %v61_v15  ;;  %78 = vst [vmem:[#allocation7 + $0x88] sm:$0xff] %v62_v16 }
  0x31   :  { %160 = shalt.err (!%p157_p6)
}
  0x32   :  { %s161_s11 = scalar_lea.hbm %s244_s2, 2304 }
  0x33   :  { %p162_p7 = scmp.ne.s32.totalorder %s244_s2, %s161_s11  ;;  %p165_p8 = scmp.lt.u32.totalorder %s161_s11, %s244_s2 }
  0x35   :  { %p167_p9 = pnand %p165_p8, %p162_p7 }
  0x37   :  { %170 = shalt.err (!%p167_p9)
}
  0x38   :  { %s182_s16 = smov 1152   ;;  %s183_s17 = smov 72  }
  0x39   :  { %90 = dma.vmem_to_hbm [thread:$0]  %s85_s8, 2304, %s244_s2, [#allocation4], %s182_s16, %s182_s16, %s183_s17  }
  0x3a   :  { %175 = dma.done.wait [#allocation4], 2304  }
  0x3b   :  { %176 = vsyncadd [#allocation4], 4294964992 }
  0x3c   :  { %94 = vsyncpa [#allocation3], 1 }
  0x3d   :  { %95 = vsyncpa [#allocation6], 1 }
  0x3e   :  { %96 = vsyncpa [#allocation4], 1 }

</bundles_post_ra>
